<compile_context>
chip_gen: v6e
topology: v6e:2x2x1
jax: 0.10.0
libtpu: 0.0.40
codegen_flags: <defaults>
</compile_context>

<pallas_src>
import jax
import jax.numpy as jnp
from jax.experimental import pallas as pl
from jax.experimental.pallas import tpu as pltpu

# ---------------------------------------------------------------------------
# Module-level energy constants (globals in loss/losses.py).  Deterministic
# synthetic values roughly matching MUSDB18 per-stem average energies.
# ---------------------------------------------------------------------------
VOC_ENERGY = 0.0278
BAS_ENERGY = 0.0279
DRU_ENERGY = 0.0446
OTH_ENERGY = 0.0323
ACC_ENERGY = BAS_ENERGY + DRU_ENERGY + OTH_ENERGY  # accompaniment (K == 2 case)


# ---------------------------------------------------------------------------
# Pallas kernel: per-(source, F-tile) partial sum of |pred - gt|
# ---------------------------------------------------------------------------
def _l1_partial_kernel(gt_ref, pred_ref, out_ref):
    # gt_ref / pred_ref: (B, F_TILE, T) block for source k, F-tile f
    #                    (the K dim is squeezed out by the BlockSpec).
    # out_ref: (1, 1, 1, T) VMEM block — lane-vector partial sum for (k, f).
    diff = jnp.abs(
        pred_ref[...].astype(jnp.float32) - gt_ref[...].astype(jnp.float32)
    )
    partial = jnp.sum(diff, axis=(0, 1))              # (T,) per-lane partial
    out_ref[...] = partial[None, None, None, :]


def _choose_f_tile(B, F_, T, itemsize):
    """Largest F-tile that (a) divides F, (b) is sublane friendly, and
    (c) keeps 2 inputs x 2 pipeline buffers comfortably inside scoped VMEM
    on every TPU generation (v5e 16 MiB default, v7x 64 MiB physical)."""
    budget_bytes = 12 * 1024 * 1024            # for 2 inputs x 2 buffers
    per_row = 4 * B * T * itemsize             # bytes per F-row across those
    max_rows = max(1, budget_bytes // per_row)
    target = int(min(F_, max_rows, 512))       # >512 rows: no measurable gain
    for ft in range(target, 0, -1):
        if F_ % ft == 0 and (ft % 8 == 0 or ft == F_):
            return ft
    return F_


def per_source_l1(gt_mags_sq, pred_mags_sq, f_tile=None):
    """Returns f32[K]: mean(|pred[:, k] - gt[:, k]|) for each source k."""
    B, K, F_, T = gt_mags_sq.shape
    if f_tile is None:
        f_tile = _choose_f_tile(B, F_, T, gt_mags_sq.dtype.itemsize)
    assert F_ % f_tile == 0, "f_tile must divide the frequency dimension"
    n_tiles = F_ // f_tile

    partials = pl.pallas_call(
        _l1_partial_kernel,
        out_shape=jax.ShapeDtypeStruct((K, n_tiles, 1, T), jnp.float32),
        grid_spec=pltpu.PrefetchScalarGridSpec(
            num_scalar_prefetch=0,
            grid=(K, n_tiles),
            in_specs=[
                pl.BlockSpec(
                    (B, pl.Squeezed(), f_tile, T), lambda k, f: (0, k, f, 0)
                ),
                pl.BlockSpec(
                    (B, pl.Squeezed(), f_tile, T), lambda k, f: (0, k, f, 0)
                ),
            ],
            out_specs=pl.BlockSpec((1, 1, 1, T), lambda k, f: (k, f, 0, 0)),
        ),
        compiler_params=pltpu.CompilerParams(
            # Both axes write disjoint output blocks -> fully parallel-safe;
            # on v7x the megacore shards the grid across its 2 TensorCores.
            dimension_semantics=("parallel", "parallel"),
            vmem_limit_bytes=32 * 1024 * 1024,
        ),
    )(gt_mags_sq, pred_mags_sq)

    # Tiny final reduction (K * n_tiles * T elements) + mean normalization.
    sums = jnp.sum(partials, axis=(1, 2, 3))          # (K,)
    return sums / jnp.float32(B * F_ * T)


# ---------------------------------------------------------------------------
# Module equivalent
# ---------------------------------------------------------------------------
class EnergyBasedLossPowerP:
    """JAX/Pallas port of loss/losses.py::EnergyBasedLossPowerP.forward."""

    def __init__(self, power=1, num_sources=4):
        self.power = power
        self.K = num_sources  # corresponds to the global K in the original file

    def __call__(self, x, f_tile=None):
        # TODO(synk): if upstream can pass gt_mags/pred_mags in bf16 (or unsquared
        # mags), fuse the squaring / downcast into this kernel to halve HBM reads.
        gt_mags_sq, pred_mags_sq, gt_mags, _, _, _ = x
        losses = per_source_l1(gt_mags_sq, pred_mags_sq, f_tile=f_tile)
        if self.K == 2:
            l1, l2 = losses[0], losses[1]
            w1 = (ACC_ENERGY / VOC_ENERGY) ** self.power
            w2 = 1.0
            l11 = w1 * l1 + w2 * l2
            return [l1, l2, l11]
        else:
            l1, l2, l3, l4 = losses[0], losses[1], losses[2], losses[3]
            w1 = (BAS_ENERGY / VOC_ENERGY) ** self.power
            w2 = (BAS_ENERGY / DRU_ENERGY) ** self.power
            l11 = w1 * l1 + w2 * l2
            w3 = 1.0
            w4 = (BAS_ENERGY / OTH_ENERGY) ** self.power
            l22 = w3 * l3 + w4 * l4
            return [l1, l2, l3, l4, l11 + l22]


# ---------------------------------------------------------------------------
# Pure-JAX reference (for correctness checking)
# ---------------------------------------------------------------------------
def _reference(x, power=1, num_sources=4):
    gt_mags_sq, pred_mags_sq, *_ = x
    l = [jnp.mean(jnp.abs(pred_mags_sq[:, k] - gt_mags_sq[:, k]))
         for k in range(gt_mags_sq.shape[1])]
    if num_sources == 2:
        w1 = (ACC_ENERGY / VOC_ENERGY) ** power
        return [l[0], l[1], w1 * l[0] + 1.0 * l[1]]
    w1 = (BAS_ENERGY / VOC_ENERGY) ** power
    w2 = (BAS_ENERGY / DRU_ENERGY) ** power
    w4 = (BAS_ENERGY / OTH_ENERGY) ** power
    l11 = w1 * l[0] + w2 * l[1]
    l22 = 1.0 * l[2] + w4 * l[3]
    return [l[0], l[1], l[2], l[3], l11 + l22]


if __name__ == "__main__":
    key = jax.random.PRNGKey(0)
    k1, k2, k3, k4, k5 = jax.random.split(key, 5)

    # ---- K = 4 case (small magnitude-spectrogram shapes); force 2 F-tiles ----
    B, K, F_, T = 2, 4, 16, 128
    gt_mags_sq = jax.random.uniform(k1, (B, K, F_, T), dtype=jnp.float32)
    pred_mags_sq = jax.random.uniform(k2, (B, K, F_, T), dtype=jnp.float32)
    gt_mags = jax.random.uniform(k3, (B, K, F_, T), dtype=jnp.float32)
    # The remaining tuple entries are unused by the forward pass.
    x4 = (gt_mags_sq, pred_mags_sq, gt_mags, None, None, None)

    loss_fn4 = EnergyBasedLossPowerP(power=1, num_sources=K)
    out4 = loss_fn4(x4, f_tile=8)  # exercises the multi-tile (K, n_tiles) grid
    out4 = [jax.block_until_ready(o) for o in out4]
    ref4 = _reference(x4, power=1, num_sources=K)
    for a, b in zip(out4, ref4):
        assert abs(float(a) - float(b)) < 1e-4, (float(a), float(b))

    # ---- K = 2 case (auto tile sizing) ----
    gt2 = jax.random.uniform(k4, (B, 2, F_, T), dtype=jnp.float32)
    pr2 = jax.random.uniform(k5, (B, 2, F_, T), dtype=jnp.float32)
    x2 = (gt2, pr2, gt2, None, None, None)

    loss_fn2 = EnergyBasedLossPowerP(power=1, num_sources=2)
    out2 = loss_fn2(x2)
    out2 = [jax.block_until_ready(o) for o in out2]
    ref2 = _reference(x2, power=1, num_sources=2)
    for a, b in zip(out2, ref2):
        assert abs(float(a) - float(b)) < 1e-4, (float(a), float(b))

    print("KERNEL_OK")
</pallas_src>

<mosaic_0001>
module attributes {stable_mosaic.version = 11 : i64} {
  func.func @_l1_partial_kernel(%arg0: i32, %arg1: i32, %arg2: memref<2x1x8x128xf32, #tpu.memory_space<vmem>>, %arg3: memref<2x1x8x128xf32, #tpu.memory_space<vmem>>, %arg4: memref<1x1x1x128xf32, #tpu.memory_space<vmem>>) attributes {dimension_semantics = [#tpu.dimension_semantics<parallel>, #tpu.dimension_semantics<parallel>], iteration_bounds = array<i64: 4, 2>, scalar_prefetch = 0 : i64, scratch_operands = 0 : i64, tpu.core_type = #tpu.core_type<tc>, window_params = [{transform_indices = @transform_0, window_bounds = array<i64: 2, 1, 8, 128>}, {transform_indices = @transform_1, window_bounds = array<i64: 2, 1, 8, 128>}, {transform_indices = @transform_2, window_bounds = array<i64: 1, 1, 1, 128>}]} {
    %c0 = arith.constant 0 : index
    %c0_0 = arith.constant 0 : index
    %c0_1 = arith.constant 0 : index
    %c0_2 = arith.constant 0 : index
    %0 = vector.load %arg3[%c0, %c0_0, %c0_1, %c0_2] : memref<2x1x8x128xf32, #tpu.memory_space<vmem>>, vector<2x1x8x128xf32>
    %1 = vector.shape_cast %0 : vector<2x1x8x128xf32> to vector<2x8x128xf32>
    %c0_3 = arith.constant 0 : index
    %c0_4 = arith.constant 0 : index
    %c0_5 = arith.constant 0 : index
    %c0_6 = arith.constant 0 : index
    %2 = vector.load %arg2[%c0_3, %c0_4, %c0_5, %c0_6] : memref<2x1x8x128xf32, #tpu.memory_space<vmem>>, vector<2x1x8x128xf32>
    %3 = vector.shape_cast %2 : vector<2x1x8x128xf32> to vector<2x8x128xf32>
    %4 = arith.subf %1, %3 : vector<2x8x128xf32>
    %5 = math.absf %4 : vector<2x8x128xf32>
    %cst = arith.constant dense<0.000000e+00> : vector<128xf32>
    %6 = vector.multi_reduction <add>, %5, %cst [0, 1] : vector<2x8x128xf32> to vector<128xf32>
    %7 = vector.shape_cast %6 : vector<128xf32> to vector<1x1x1x128xf32>
    %c0_7 = arith.constant 0 : index
    %c0_8 = arith.constant 0 : index
    %c0_9 = arith.constant 0 : index
    %c0_10 = arith.constant 0 : index
    %8 = vector.load %arg4[%c0_7, %c0_8, %c0_9, %c0_10] : memref<1x1x1x128xf32, #tpu.memory_space<vmem>>, vector<1x1x1x128xf32>
    tpu.vector_store %arg4[%c0_7, %c0_8, %c0_9, %c0_10], %7 {strides = array<i32>} : memref<1x1x1x128xf32, #tpu.memory_space<vmem>>, vector<1x1x1x128xf32>,
    return
  }
  func.func @transform_0(%arg0: i32, %arg1: i32) -> (i32, i32, i32, i32) {
    %c0_i32 = arith.constant 0 : i32
    %c0_i32_0 = arith.constant 0 : i32
    %c0_i32_1 = arith.constant 0 : i32
    return %c0_i32, %arg0, %arg1, %c0_i32_0 : i32, i32, i32, i32
  }
  func.func @transform_1(%arg0: i32, %arg1: i32) -> (i32, i32, i32, i32) {
    %c0_i32 = arith.constant 0 : i32
    %c0_i32_0 = arith.constant 0 : i32
    %c0_i32_1 = arith.constant 0 : i32
    return %c0_i32, %arg0, %arg1, %c0_i32_0 : i32, i32, i32, i32
  }
  func.func @transform_2(%arg0: i32, %arg1: i32) -> (i32, i32, i32, i32) {
    %c0_i32 = arith.constant 0 : i32
    %c0_i32_0 = arith.constant 0 : i32
    %c0_i32_1 = arith.constant 0 : i32
    return %arg0, %arg1, %c0_i32, %c0_i32_0 : i32, i32, i32, i32
  }
}

</mosaic_0001>

<bundles_post_ra>
// kernel: tpu_custom_call.1
= control target key start
LH: loop header
LB: loop body
LE: loop exit
PB: predicated region body
PF: predicated region fallthrough
CT: control target
= control target key end

     0   :  { %s829_s0 = inlined_call_operand.hbm [shape: f32[2,4,16,128], index: 0, kind: input, shape index: {}]   ;;  %s830_s1 = inlined_call_operand.hbm [shape: f32[2,4,16,128], index: 1, kind: input, shape index: {}]   ;;  %s831_s2 = inlined_call_operand.hbm [shape: f32[4,2,1,128], index: 2, kind: output, shape index: {}]  }
   0x1   :  { %835 = sst [smem:[#allocation14_spill]] %s829_s0 }
   0x2   :  { %7 = vsyncpa [#allocation3], 0 }
   0x3   :  { %9 = vsyncpa [#allocation3 + $0x1], 0 }
   0x4   :  { %10 = vsyncpa [#allocation6], 0 }
   0x5   :  { %12 = vsyncpa [#allocation6 + $0x1], 0 }
   0x6   :  { %13 = vsyncpa [#allocation4], 0 }
   0x7   :  { %15 = vsyncpa [#allocation4 + $0x1], 0  ;;  %s640_s9 = smov 0   ;;  %s642_s10 = smov 0  }
   0x8   :  { %s644_s11 = smov 0   ;;  %s646_s12 = smov 0  }
   0x9   :  { %s648_s13 = smov 0   ;;  %s650_s14 = smov 0  }
   0xa   :  { %s652_s15 = smov 0   ;;  %s654_s16 = smov 0  }
   0xb LB: > { %836 = sst [smem:[#allocation11_spill]] %s613_s15  ;;  %s358_s17 = sadd.s32 4294967295, %s617_s16   ;;  %s617_s16 = sphi %s654_s16, %s21_s16   ;;  %s613_s15 = sphi %s652_s15, %s848_s15   ;;  %s609_s14 = sphi %s650_s14, %s853_s14   ;;  %s605_s13 = sphi %s648_s13, %s846_s13   ;;  %s601_s12 = sphi %s646_s12, %s852_s12   ;;  %s597_s11 = sphi %s644_s11, %s851_s11   ;;  %s593_s10 = sphi %s642_s10, %s850_s10   ;;  %s589_s9 = sphi %s640_s9, %s849_s9  }
   0xc   : > { %s359_s18 = sadd.s32 4294967294, %s617_s16   ;;  %s30_s19 = sadd.s32 1, %s609_s14 }
   0xd   : > { %s33_s20 = sadd.s32 1, %s613_s15  ;;  %p31_p0 = scmp.ge.s32.totalorder %s30_s19, 2 }
   0xe   : > { %s42_s21 = sadd.s32 1, %s597_s11  ;;  %p49_p1 = scmp.ne.s32.totalorder %s597_s11, %s593_s10 }
   0xf   : > { %p50_p2 = scmp.eq.s32.totalorder %s617_s16, 0  ;;  %s855_s19 = smov (%p31_p0, %s30_s19), 0 }
  0x10   : > { %837 = sst [smem:[#allocation12_spill]] %s855_s19  ;;  %s857_s20 = smov (!%p31_p0, %s33_s20), %s613_s15 }
  0x11   : > { %s38_s22 = ssub.s32 %s609_s14, %s855_s19  ;;  %p693_p3 = por %p50_p2, %p49_p1 }
  0x12   : > { %p35_p4 = scmp.ge.s32.totalorder %s857_s20, 4  ;;  %p55_p5 = scmp.ne.s32.totalorder %s593_s10, %s589_s9 }
  0x13   : > { %p56_p6 = scmp.eq.s32.totalorder %s358_s17, 0  ;;  %p109_p7 = scmp.eq.s32.totalorder %s358_s17, 7 }
  0x14   : > { %s859_s20 = smov (%p35_p4, %s857_s20), 0  ;;  %p115_p10 = scmp.eq.s32.totalorder %s359_s18, 7 }
  0x15   : > { %839 = sst [smem:[#allocation13_spill]] %s859_s20  ;;  %p701_p8 = por %p56_p6, %p55_p5 }
  0x16   : > { %p705_p9 = por %p109_p7, %p49_p1  ;;  %s37_s26 = ssub.s32 %s613_s15, %s859_s20 }
  0x17   : > { %s39_s27 = sor.u32 %s38_s22, %s37_s26  ;;  %p711_p12 = por %p115_p10, %p55_p5 }
  0x18   : > { %p40_p11 = scmp.eq.s32.totalorder %s39_s27, 0  ;;  %p392_p13 = scmp.lt.s32.totalorder %s617_s16, 8 }
  0x19   : > { %s717_s29 = sand.u32 1, %s597_s11   ;;  %s363_s4 = sshll.u32 %s613_s15, 1 }
  0x1a   : > { %s720_s30 = scalar_select %p40_p11, %s597_s11, %s42_s21  }
  0x1b   : > { %s362_s3 = sshll.u32 %s717_s29, 4  ;;  %s725_s5 = sadd.s32 %s609_s14, %s363_s4 }
  0x1c   : > { %s139_s6 = scalar_lea.vmem [#allocation2], %s362_s3  ;;  %s364_s8 = sshll.u32 %s725_s5, 7 }
  0x1d   : > { %s147_s7 = sshll.u32 %s139_s6, 4  ;;  %s843_s0 = sld [smem:[#allocation14_spill]]  ;;  %s148_s7 = int_to_ptr.vmem [resolvable:$true] %s147_s7 }
  0x1e   : > { %p735_p0 = pnand %p392_p13, %p693_p3  ;;  %s136_s21 = scalar_lea.sflag [#allocation3], %s717_s29 }
  0x1f   : > { %s474_s27 = scalar_lea.vmem %s148_s7, 256  ;;  %s619_s4 = smov [#allocation2]  }
  0x20   : > { %p463_p1 = pneg %p735_p0  ;;  %p475_p2 = scmp.ne.s32.totalorder %s148_s7, %s474_s27 }
  0x21   : > { %s479_s5 = sshll.u32 %s619_s4, 4  ;;  %s480_s5 = int_to_ptr.vmem [resolvable:$false] %s479_s5 }
  0x22   : > { %p477_p4 = pnand %p475_p2, %p463_p1  ;;  %s481_s6 = scalar_lea.vmem %s480_s5, 512 }
  0x23   : > { %s146_s22 = scalar_lea.hbm %s843_s0, %s364_s8  ;;  %p482_p6 = scmp.lt.s32.totalorder %s148_s7, %s480_s5 }
  0x24   : > { %p478_p5 = pneg %p477_p4  ;;  %p483_p3 = scmp.lt.s32.totalorder %s481_s6, %s474_s27 }
  0x26   : > { %p484_p7 = por %p483_p3, %p482_p6 }
  0x28   : > { %p485_p10 = pnand %p484_p7, %p478_p5 }
  0x2a   : > { %488 = shalt.err (!%p485_p10)
}
  0x2b   : > { %s620_s23 = smov 1024   ;;  %s621_s17 = smov 128  }
  0x2c   : > { %s622_s18 = smov 8   ;;  %p368_p11 = scmp.ge.s32.totalorder %s617_s16, 1 }
  0x2d   : > { %384 = dma.hbm_to_vmem [thread:$0]  (!%p735_p0), %s146_s22, 256, %s148_s7, %s136_s21, %s620_s23, %s621_s17, %s622_s18  }
  0x2e   : > { %p177_p13 = scmp.lt.s32.totalorder %s617_s16, 9  ;;  %s168_s6 = scalar_lea.hbm %s830_s1, %s364_s8 }
  0x2f   : > { %s161_s0 = scalar_lea.vmem [#allocation5], %s362_s3  ;;  %s158_s19 = scalar_lea.sflag [#allocation6], %s717_s29 }
  0x30   : > { %p750_p2 = pnand %p368_p11, %p177_p13  ;;  %s169_s20 = sshll.u32 %s161_s0, 4  ;;  %s170_s20 = int_to_ptr.vmem [resolvable:$true] %s169_s20 }
  0x31   : > { %s502_s15 = scalar_lea.vmem %s170_s20, 256  ;;  %s623_s7 = smov [#allocation5]  }
  0x32   : > { %p503_p4 = scmp.ne.s32.totalorder %s170_s20, %s502_s15  ;;  %s507_s22 = sshll.u32 %s623_s7, 4  ;;  %s508_s22 = int_to_ptr.vmem [resolvable:$false] %s507_s22 }
  0x33   : > { %s509_s21 = scalar_lea.vmem %s508_s22, 512  ;;  %p510_p3 = scmp.lt.s32.totalorder %s170_s20, %s508_s22 }
  0x34   : > { %p505_p5 = pnand %p503_p4, %p463_p1  ;;  %p511_p7 = scmp.lt.s32.totalorder %s509_s21, %s502_s15 }
  0x36   : > { %p506_p6 = pneg %p505_p5  ;;  %p512_p10 = por %p511_p7, %p510_p3 }
  0x38   : > { %p513_p11 = pnand %p512_p10, %p506_p6 }
  0x3a   : > { %516 = shalt.err (!%p513_p11)
}
  0x3b   : > { %387 = dma.hbm_to_vmem [thread:$0]  (!%p735_p0), %s168_s6, 256, %s170_s20, %s158_s19, %s620_s23, %s621_s17, %s622_s18  }
  0x3c   : > { %181 = sbr.rel (%p750_p2) target bundleno = 101 (0x65), region = 28  ;;  %s769_s0 = sand.u32 (!%p750_p2), 1, %s593_s10  }
  0x3d   : > { %s369_s29 = sshll.u32 (!%p750_p2), %s769_s0, 4  ;;  %s184_s3 = scalar_lea.sflag (!%p750_p2), [#allocation3], %s769_s0 }
  0x3e   : > { %s187_s8 = scalar_lea.vmem (!%p750_p2), [#allocation2], %s369_s29 }
  0x41   : > { %576 = dma.done.wait (%p701_p8), %s184_s3, 256  }
  0x42   : > { %578 = vsyncadd (%p701_p8), %s184_s3, 4294967040  ;;  %s193_s15 = scalar_lea.sflag [#allocation6], %s769_s0  ;;  %s196_s19 = scalar_lea.vmem [#allocation5], %s369_s29 }
  0x43   : > { %580 = dma.done.wait (%p701_p8), %s193_s15, 256  }
  0x44   : > { %582 = vsyncadd (%p701_p8), %s193_s15, 4294967040  ;;  %v221_v0 = vld [vmem:[%s196_s19] sm:$0xff]  ;;  %v222_v1 = vld [vmem:[%s196_s19 + $0x8] sm:$0xff]  ;;  %s371_s20 = sshll.u32 %s605_s13, 1  ;;  %s220_s26 = scalar_lea.vmem [#allocation7], %s769_s0 }
  0x45   : > { %v223_v2 = vld [vmem:[%s187_s8] sm:$0xff]  ;;  %v224_v3 = vld [vmem:[%s187_s8 + $0x8] sm:$0xff]  ;;  %s248_s24 = sadd.s32 %s601_s12, %s371_s20  ;;  %s252_s23 = sshll.u32 %s220_s26, 4  ;;  %s253_s23 = int_to_ptr.vmem [resolvable:$true] %s252_s23 }
  0x46   : > { %v225_v4 = vsub.f32 %v221_v0, %v223_v2  ;;  %v226_v5 = vsub.f32 %v222_v1, %v224_v3  ;;  %s372_s17 = sshll.u32 %s248_s24, 4  ;;  %s238_s5 = scalar_lea.sflag [#allocation4], %s769_s0 }
  0x47   : > { %s250_s27 = scalar_lea.hbm %s831_s2, %s372_s17  ;;  %s517_s6 = scalar_lea.vmem %s253_s23, 16 }
  0x48   : > { %v227_v6 = vand.u32 2147483647, %v225_v4  ;;  %v228_v7 = vand.u32 2147483647, %v226_v5  ;;  %p518_p8 = scmp.ne.s32.totalorder %s253_s23, %s517_s6  ;;  %s624_s13 = smov [#allocation7]  }
  0x49   : > { %s521_s12 = sshll.u32 %s624_s13, 4  ;;  %s522_s12 = int_to_ptr.vmem [resolvable:$false] %s521_s12 }
  0x4a   : > { %v229_v8 = vadd.f32 %v228_v7, %v227_v6  ;;  %p519_p0 = pnand %p518_p8, %p705_p9  ;;  %s523_s7 = scalar_lea.vmem %s522_s12, 32 }
  0x4b   : > { %p524_p13 = scmp.lt.s32.totalorder %s253_s23, %s522_s12  ;;  %p525_p2 = scmp.lt.s32.totalorder %s523_s7, %s517_s6 }
  0x4c   : > { %v230_v9 = vrot.slane %v229_v8, 4  ;;  %p520_p1 = pneg %p519_p0 }
  0x4d   : > { %p526_p4 = por %p525_p2, %p524_p13 }
  0x4e   : > { %v231_v10 = vadd.f32 %v230_v9, %v229_v8 }
  0x4f   : > { %p527_p5 = pnand %p526_p4, %p520_p1 }
  0x50   : > { %v232_v11 = vrot.slane %v231_v10, 2 }
  0x52   : > { %v233_v12 = vadd.f32 %v232_v11, %v231_v10 }
  0x54   : > { %v234_v13 = vrot.slane %v233_v12, 1 }
  0x56   : > { %v235_v14 = vadd.f32 %v234_v13, %v233_v12 }
  0x58   : > { %236 = vst [vmem:[%s220_s26] sm:$0x1] %v235_v14 }
  0x59   : > { %530 = shalt.err (!%p527_p5)
}
  0x5a   : > { %s531_s22 = scalar_lea.hbm %s250_s27, 16  ;;  %s535_s29 = scalar_lea.hbm %s831_s2, 128 }
  0x5b   : > { %p532_p6 = scmp.ne.s32.totalorder %s250_s27, %s531_s22  ;;  %p536_p10 = scmp.lt.s32.totalorder %s250_s27, %s831_s2 }
  0x5c   : > { %p537_p11 = scmp.lt.s32.totalorder %s535_s29, %s531_s22 }
  0x5d   : > { %p533_p3 = pnand %p532_p6, %p705_p9 }
  0x5e   : > { %p538_p8 = por %p537_p11, %p536_p10 }
  0x5f   : > { %p534_p7 = pneg %p533_p3 }
  0x61   : > { %p539_p0 = pnand %p538_p8, %p534_p7 }
  0x63   : > { %542 = shalt.err (!%p539_p0)
}
  0x64   : > { %379 = dma.vmem_to_hbm [thread:$0]  (%p705_p9), %s253_s23, 16, %s250_s27, %s238_s5  }
  0x65 PF: > { %p393_p1 = scmp.ge.s32.totalorder %s617_s16, 2  ;;  %s264_s15 = sand.u32 1, %s589_s9  }
  0x66   : > { %s265_s19 = scalar_lea.sflag [#allocation4], %s264_s15 }
  0x67   : > { %p389_p13 = pnand %p393_p1, %p711_p12 }
  0x69   : > { %p390_p2 = pneg %p389_p13 }
  0x6b   : > { %584 = dma.done.wait (%p390_p2), %s265_s19, 16  }
  0x6c   : > { %586 = vsyncadd (%p390_p2), %s265_s19, 4294967280  ;;  %s21_s16 = sadd.s32 1, %s617_s16   ;;  %s846_s13 = sld [smem:[#allocation11_spill]] }
  0x6d   : > { %p18_p4 = scmp.ge.s32.totalorder %s21_s16, 10   ;;  %s847_s25 = sld [smem:[#allocation12_spill]] }
  0x6e   : > { %s848_s15 = sld [smem:[#allocation13_spill]]  ;;  %s849_s9 = smov %s593_s10 }
  0x6f   : > { %s850_s10 = smov %s597_s11  ;;  %s851_s11 = smov %s720_s30 }
  0x70   : > { %s852_s12 = smov %s609_s14  ;;  %20 = sbr.rel (!%p18_p4) target bundleno = 11 (0xb), region = 86 }
  0x73   : > { %s853_s14 = smov %s847_s25 }
  0x75   :  { %269 = vsyncpa [#allocation3], 1 }
  0x76   :  { %271 = vsyncpa [#allocation3 + $0x1], 1 }
  0x77   :  { %272 = vsyncpa [#allocation6], 1 }
  0x78   :  { %274 = vsyncpa [#allocation6 + $0x1], 1 }
  0x79   :  { %275 = vsyncpa [#allocation4], 1 }
  0x7a   :  { %277 = vsyncpa [#allocation4 + $0x1], 1 }

</bundles_post_ra>
